<compile_context>
chip_gen: v7x
topology: tpu7x:2x2x1
jax: 0.10.0
libtpu: 0.0.40
codegen_flags: <defaults>
</compile_context>

<pallas_src>
import functools

import jax
import jax.numpy as jnp
from jax import lax
from jax.experimental import pallas as pl
from jax.experimental.pallas import tpu as pltpu

HIDDEN = 32  # HIDEN_NEURONS_PER_LAYER


def _default_compute_dtype():
    """bf16 elementwise on v6e/v7x (packed VPU/EUP); fp32 on v5e and older."""
    try:
        kind = jax.devices()[0].device_kind.lower()
    except Exception:
        return jnp.float32
    if "tpu" not in kind:
        return jnp.float32
    if any(g in kind for g in ("v2", "v3", "v4", "v5")):
        return jnp.float32
    return jnp.bfloat16


def _silu_to_bf16(z_f32, compute_dtype):
    # sigmoid(z) == 0.5*tanh(z/2) + 0.5 -> one EUP transcendental per element
    # (no exp/divide expansion); bf16 on v6e/v7x, fp32 on v5e.
    z = z_f32.astype(compute_dtype)
    h = z * (0.5 * jnp.tanh(0.5 * z) + 0.5)
    return h.astype(jnp.bfloat16)  # operand dtype for the next MXU matmul


def _decoder_preround_t(x, w1, b1, w2, b2, w3, b3, compute_dtype):
    """Shared math for the kernel body and the pure-JAX reference.

    x: (n, latent) float; w*: (out, in) bf16 (torch nn.Linear layout);
    b*: (out, 1) fp32.  Returns y^T: (out_dim, n) fp32, pre-round.
    """
    xb = x.astype(jnp.bfloat16)
    # h1^T = W1 @ x^T without materializing x^T: contract the last dim of both
    # operands (MXU matmul with transposed RHS).
    z1 = lax.dot_general(w1, xb, (((1,), (1,)), ((), ())),
                         preferred_element_type=jnp.float32) + b1
    h1 = _silu_to_bf16(z1, compute_dtype)
    z2 = jnp.dot(w2, h1, preferred_element_type=jnp.float32) + b2
    h2 = _silu_to_bf16(z2, compute_dtype)
    y = jnp.dot(w3, h2, preferred_element_type=jnp.float32) + b3
    return y


def decoder_kernel(x_ref, w1_ref, b1_ref, w2_ref, b2_ref, w3_ref, b3_ref,
                   o_ref, *, compute_dtype):
    y = _decoder_preround_t(x_ref[...], w1_ref[...], b1_ref[...], w2_ref[...],
                            b2_ref[...], w3_ref[...], b3_ref[...],
                            compute_dtype)
    # torch.round == round-half-to-even == jnp.round; lane-dense (out, block_b) store.
    o_ref[...] = jnp.round(y).astype(o_ref.dtype)


def decoder_forward(x, params, *, block_b=None, compute_dtype=None,
                    out_dtype=jnp.float32, transposed_output=False):
    """x: (B, latent) float32 -> rounded output.

    Returns (B, out_dim); with transposed_output=True returns (out_dim, B)
    directly and skips the final wrapper layout pass.
    """
    B, latent_dim = x.shape
    hidden = params["w1"].shape[0]
    out_dim = params["w3"].shape[0]

    if compute_dtype is None:
        compute_dtype = _default_compute_dtype()

    # Batch sits on the 128-wide lane axis of every compute/output tile.
    if block_b is None:
        block_b = 16384
    if block_b >= B:
        block_b = B                                   # single full-batch tile
    else:
        block_b = max(128, (block_b // 128) * 128)    # lane-dense tiles

    n_blocks = pl.cdiv(B, block_b)                    # ragged tail -> partial last block

    # Scoped-VMEM limit sized from the tile; clamp to v7x's 64 MiB physical.
    x_bytes = block_b * latent_dim * x.dtype.itemsize
    out_bytes = block_b * out_dim * jnp.dtype(out_dtype).itemsize
    inter_bytes = 4 * block_b * hidden * 4            # a few (hidden, block_b) f32 temps
    est = 2 * (x_bytes + out_bytes) + inter_bytes + (1 << 20)
    vmem_limit = int(min(64 * 2**20, max(32 * 2**20, 3 * est // 2)))

    kernel = functools.partial(decoder_kernel, compute_dtype=compute_dtype)

    out_t = pl.pallas_call(
        kernel,
        out_shape=jax.ShapeDtypeStruct((out_dim, B), out_dtype),
        grid_spec=pltpu.PrefetchScalarGridSpec(
            num_scalar_prefetch=0,
            grid=(n_blocks,),
            in_specs=[
                # x tile, natural (B, latent) layout (no wrapper transpose/pad).
                pl.BlockSpec((block_b, latent_dim), lambda i: (i, 0)),
                # Weights / biases: tiny, grid-invariant full blocks (constant
                # index_map -> not re-DMA'd per step).
                pl.BlockSpec((hidden, latent_dim), lambda i: (0, 0)),
                pl.BlockSpec((hidden, 1), lambda i: (0, 0)),
                pl.BlockSpec((hidden, hidden), lambda i: (0, 0)),
                pl.BlockSpec((hidden, 1), lambda i: (0, 0)),
                pl.BlockSpec((out_dim, hidden), lambda i: (0, 0)),
                pl.BlockSpec((out_dim, 1), lambda i: (0, 0)),
            ],
            out_specs=pl.BlockSpec((out_dim, block_b), lambda i: (0, i)),
        ),
        compiler_params=pltpu.CompilerParams(
            dimension_semantics=("parallel",),   # megacore / v7x dual-TC sharding
            vmem_limit_bytes=vmem_limit,
        ),
    )(x, params["w1"], params["b1"], params["w2"], params["b2"],
      params["w3"], params["b3"])

    if transposed_output:
        return out_t            # (out_dim, B), lane-dense, no extra HBM pass
    return out_t.T              # (B, out_dim), original module semantics


def init_params(key, latent_dim, output_dim):
    """Deterministic synthetic init (uniform, PyTorch-Linear-like fan_in scaling)."""
    ks = jax.random.split(key, 6)

    def lin(kw, kb, fan_in, fan_out):
        bound = 1.0 / jnp.sqrt(fan_in)
        # (out, in) layout == torch nn.Linear.weight layout.
        w = jax.random.uniform(kw, (fan_out, fan_in), jnp.float32, -bound, bound)
        b = jax.random.uniform(kb, (fan_out, 1), jnp.float32, -bound, bound)
        return w.astype(jnp.bfloat16), b

    w1, b1 = lin(ks[0], ks[1], latent_dim, HIDDEN)
    w2, b2 = lin(ks[2], ks[3], HIDDEN, HIDDEN)
    w3, b3 = lin(ks[4], ks[5], HIDDEN, output_dim)
    return {"w1": w1, "b1": b1, "w2": w2, "b2": b2, "w3": w3, "b3": b3}


def decoder_reference_preround(x, p, compute_dtype):
    """Pure-JAX reference with the same dtype recipe; (B, out_dim) pre-round."""
    return _decoder_preround_t(x, p["w1"], p["b1"], p["w2"], p["b2"],
                               p["w3"], p["b3"], compute_dtype).T


if __name__ == "__main__":
    key = jax.random.PRNGKey(0)
    k_x, k_p = jax.random.split(key)

    latent_dim, output_dim = 8, 16
    params = init_params(k_p, latent_dim, output_dim)
    cdt = _default_compute_dtype()

    def check(B, block_b=None):
        kx = jax.random.fold_in(k_x, B)
        x = 4.0 * jax.random.normal(kx, (B, latent_dim), dtype=jnp.float32)

        out = jax.block_until_ready(
            decoder_forward(x, params, block_b=block_b, compute_dtype=cdt))
        assert out.shape == (B, output_dim)
        assert bool(jnp.all(jnp.isfinite(out)))

        # Accepted contract: matmul operands are bf16 (fp32 accumulate), so the
        # result can differ from a pure-fp32 torch Decoder near .5 boundaries.
        # The reference uses the exact same dtype recipe; the extra slack only
        # covers Mosaic-vs-XLA tanh lowering differences (larger in bf16 mode).
        y = decoder_reference_preround(x, params, cdt)     # pre-round, fp32
        tol = (0.05 + 0.05 * jnp.abs(y)) if cdt == jnp.bfloat16 \
            else (0.01 + 0.01 * jnp.abs(y))
        ok = jnp.abs(out - y) <= 0.5 + tol
        assert bool(jnp.all(ok)), f"mismatch vs pure-JAX reference (B={B})"

    check(B=8)                   # tiny batch: one full-B tile
    check(B=256, block_b=128)    # 2-step 'parallel' grid, 128-lane-dense tiles
    check(B=200, block_b=128)    # ragged tail handled by a partial last block

    # TODO(synk): RoundActivation's straight-through backward (identity grad)
    # is not needed for the forward pass and is not implemented here.
    print("KERNEL_OK")
</pallas_src>

<mosaic_0001>
module attributes {stable_mosaic.version = 11 : i64} {
  func.func @decoder_kernel(%arg0: i32, %arg1: memref<8x8xf32, #tpu.memory_space<vmem>>, %arg2: memref<32x8xbf16, #tpu.memory_space<vmem>>, %arg3: memref<32x1xf32, #tpu.memory_space<vmem>>, %arg4: memref<32x32xbf16, #tpu.memory_space<vmem>>, %arg5: memref<32x1xf32, #tpu.memory_space<vmem>>, %arg6: memref<16x32xbf16, #tpu.memory_space<vmem>>, %arg7: memref<16x1xf32, #tpu.memory_space<vmem>>, %arg8: memref<16x8xf32, #tpu.memory_space<vmem>>) attributes {dimension_semantics = [#tpu.dimension_semantics<parallel>], iteration_bounds = array<i64: 1>, scalar_prefetch = 0 : i64, scratch_operands = 0 : i64, tpu.core_type = #tpu.core_type<tc>, window_params = [{transform_indices = @transform_0, window_bounds = array<i64: 8, 8>}, {pipeline_mode = #tpu.pipeline_mode<synchronous>, transform_indices = @transform_1, window_bounds = array<i64: 32, 8>}, {pipeline_mode = #tpu.pipeline_mode<synchronous>, transform_indices = @transform_2, window_bounds = array<i64: 32, 1>}, {pipeline_mode = #tpu.pipeline_mode<synchronous>, transform_indices = @transform_3, window_bounds = array<i64: 32, 32>}, {pipeline_mode = #tpu.pipeline_mode<synchronous>, transform_indices = @transform_4, window_bounds = array<i64: 32, 1>}, {pipeline_mode = #tpu.pipeline_mode<synchronous>, transform_indices = @transform_5, window_bounds = array<i64: 16, 32>}, {pipeline_mode = #tpu.pipeline_mode<synchronous>, transform_indices = @transform_6, window_bounds = array<i64: 16, 1>}, {transform_indices = @transform_7, window_bounds = array<i64: 16, 8>}]} {
    %c0 = arith.constant 0 : index
    %c0_0 = arith.constant 0 : index
    %0 = vector.load %arg1[%c0, %c0_0] : memref<8x8xf32, #tpu.memory_space<vmem>>, vector<8x8xf32>
    %c0_1 = arith.constant 0 : index
    %c0_2 = arith.constant 0 : index
    %1 = vector.load %arg2[%c0_1, %c0_2] : memref<32x8xbf16, #tpu.memory_space<vmem>>, vector<32x8xbf16>
    %c0_3 = arith.constant 0 : index
    %c0_4 = arith.constant 0 : index
    %2 = vector.load %arg3[%c0_3, %c0_4] : memref<32x1xf32, #tpu.memory_space<vmem>>, vector<32x1xf32>
    %c0_5 = arith.constant 0 : index
    %c0_6 = arith.constant 0 : index
    %3 = vector.load %arg4[%c0_5, %c0_6] : memref<32x32xbf16, #tpu.memory_space<vmem>>, vector<32x32xbf16>
    %c0_7 = arith.constant 0 : index
    %c0_8 = arith.constant 0 : index
    %4 = vector.load %arg5[%c0_7, %c0_8] : memref<32x1xf32, #tpu.memory_space<vmem>>, vector<32x1xf32>
    %c0_9 = arith.constant 0 : index
    %c0_10 = arith.constant 0 : index
    %5 = vector.load %arg6[%c0_9, %c0_10] : memref<16x32xbf16, #tpu.memory_space<vmem>>, vector<16x32xbf16>
    %c0_11 = arith.constant 0 : index
    %c0_12 = arith.constant 0 : index
    %6 = vector.load %arg7[%c0_11, %c0_12] : memref<16x1xf32, #tpu.memory_space<vmem>>, vector<16x1xf32>
    %7 = arith.truncf %0 : vector<8x8xf32> to vector<8x8xbf16>
    %cst = arith.constant dense<0.000000e+00> : vector<32x8xf32>
    %8 = tpu.matmul %1, %7, %cst {dimension_numbers = #tpu.dot_dimension_numbers<[1], [1], [0], [0], [0, 0, 1, 0], [], []>} : vector<32x8xbf16>, vector<8x8xbf16>, vector<32x8xf32> -> vector<32x8xf32>
    %9 = vector.broadcast %2 : vector<32x1xf32> to vector<32x8xf32>
    %10 = arith.addf %8, %9 : vector<32x8xf32>
    %cst_13 = arith.constant 5.000000e-01 : f32
    %11 = vector.broadcast %cst_13 : f32 to vector<32x8xf32>
    %12 = arith.mulf %11, %10 : vector<32x8xf32>
    %13 = math.tanh %12 : vector<32x8xf32>
    %cst_14 = arith.constant 5.000000e-01 : f32
    %14 = vector.broadcast %cst_14 : f32 to vector<32x8xf32>
    %15 = arith.mulf %14, %13 : vector<32x8xf32>
    %cst_15 = arith.constant 5.000000e-01 : f32
    %16 = vector.broadcast %cst_15 : f32 to vector<32x8xf32>
    %17 = arith.addf %15, %16 : vector<32x8xf32>
    %18 = arith.mulf %10, %17 : vector<32x8xf32>
    %19 = arith.truncf %18 : vector<32x8xf32> to vector<32x8xbf16>
    %cst_16 = arith.constant dense<0.000000e+00> : vector<32x8xf32>
    %20 = tpu.matmul %3, %19, %cst_16 {dimension_numbers = #tpu.dot_dimension_numbers<[1], [0], [0], [1], [0, 0, 1, 1], [], []>} : vector<32x32xbf16>, vector<32x8xbf16>, vector<32x8xf32> -> vector<32x8xf32>
    %21 = vector.broadcast %4 : vector<32x1xf32> to vector<32x8xf32>
    %22 = arith.addf %20, %21 : vector<32x8xf32>
    %cst_17 = arith.constant 5.000000e-01 : f32
    %23 = vector.broadcast %cst_17 : f32 to vector<32x8xf32>
    %24 = arith.mulf %23, %22 : vector<32x8xf32>
    %25 = math.tanh %24 : vector<32x8xf32>
    %cst_18 = arith.constant 5.000000e-01 : f32
    %26 = vector.broadcast %cst_18 : f32 to vector<32x8xf32>
    %27 = arith.mulf %26, %25 : vector<32x8xf32>
    %cst_19 = arith.constant 5.000000e-01 : f32
    %28 = vector.broadcast %cst_19 : f32 to vector<32x8xf32>
    %29 = arith.addf %27, %28 : vector<32x8xf32>
    %30 = arith.mulf %22, %29 : vector<32x8xf32>
    %31 = arith.truncf %30 : vector<32x8xf32> to vector<32x8xbf16>
    %cst_20 = arith.constant dense<0.000000e+00> : vector<16x8xf32>
    %32 = tpu.matmul %5, %31, %cst_20 {dimension_numbers = #tpu.dot_dimension_numbers<[1], [0], [0], [1], [0, 0, 1, 1], [], []>} : vector<16x32xbf16>, vector<32x8xbf16>, vector<16x8xf32> -> vector<16x8xf32>
    %33 = vector.broadcast %6 : vector<16x1xf32> to vector<16x8xf32>
    %34 = arith.addf %32, %33 : vector<16x8xf32>
    %35 = math.roundeven %34 : vector<16x8xf32>
    %c0_21 = arith.constant 0 : index
    %c0_22 = arith.constant 0 : index
    %36 = vector.load %arg8[%c0_21, %c0_22] : memref<16x8xf32, #tpu.memory_space<vmem>>, vector<16x8xf32>
    tpu.vector_store %arg8[%c0_21, %c0_22], %35 {strides = array<i32>} : memref<16x8xf32, #tpu.memory_space<vmem>>, vector<16x8xf32>,
    return
  }
  func.func @transform_0(%arg0: i32) -> (i32, i32) {
    %c0_i32 = arith.constant 0 : i32
    %c0_i32_0 = arith.constant 0 : i32
    return %arg0, %c0_i32 : i32, i32
  }
  func.func @transform_1(%arg0: i32) -> (i32, i32) {
    %c0_i32 = arith.constant 0 : i32
    %c0_i32_0 = arith.constant 0 : i32
    %c0_i32_1 = arith.constant 0 : i32
    return %c0_i32, %c0_i32_0 : i32, i32
  }
  func.func @transform_2(%arg0: i32) -> (i32, i32) {
    %c0_i32 = arith.constant 0 : i32
    %c0_i32_0 = arith.constant 0 : i32
    %c0_i32_1 = arith.constant 0 : i32
    return %c0_i32, %c0_i32_0 : i32, i32
  }
  func.func @transform_3(%arg0: i32) -> (i32, i32) {
    %c0_i32 = arith.constant 0 : i32
    %c0_i32_0 = arith.constant 0 : i32
    %c0_i32_1 = arith.constant 0 : i32
    return %c0_i32, %c0_i32_0 : i32, i32
  }
  func.func @transform_4(%arg0: i32) -> (i32, i32) {
    %c0_i32 = arith.constant 0 : i32
    %c0_i32_0 = arith.constant 0 : i32
    %c0_i32_1 = arith.constant 0 : i32
    return %c0_i32, %c0_i32_0 : i32, i32
  }
  func.func @transform_5(%arg0: i32) -> (i32, i32) {
    %c0_i32 = arith.constant 0 : i32
    %c0_i32_0 = arith.constant 0 : i32
    %c0_i32_1 = arith.constant 0 : i32
    return %c0_i32, %c0_i32_0 : i32, i32
  }
  func.func @transform_6(%arg0: i32) -> (i32, i32) {
    %c0_i32 = arith.constant 0 : i32
    %c0_i32_0 = arith.constant 0 : i32
    %c0_i32_1 = arith.constant 0 : i32
    return %c0_i32, %c0_i32_0 : i32, i32
  }
  func.func @transform_7(%arg0: i32) -> (i32, i32) {
    %c0_i32 = arith.constant 0 : i32
    %c0_i32_0 = arith.constant 0 : i32
    return %c0_i32, %arg0 : i32, i32
  }
}

</mosaic_0001>

<bundles_post_ra>
// kernel: tpu_custom_call.1
= control target key start
LH: loop header
LB: loop body
LE: loop exit
PB: predicated region body
PF: predicated region fallthrough
CT: control target
= control target key end

     0   :  { %vm79_vm0 = vcmask 64512   ;;  %v406_v1 = vmov 0   ;;  %vm190_vm1 = vcmask 261120   ;;  %v407_v52 = vmov 0.0   ;;  %s512_s0 = inlined_call_operand.vmem [shape: f32[8,8], index: 0, kind: input, shape index: {}]   ;;  %s513_s1 = inlined_call_operand.vmem [shape: bf16[32,8], index: 1, kind: input, shape index: {}]   ;;  %s514_s2 = inlined_call_operand.vmem [shape: f32[32,1], index: 2, kind: input, shape index: {}]   ;;  %s515_s4 = inlined_call_operand.vmem [shape: f32[32,1], index: 4, kind: input, shape index: {}]   ;;  %s516_s6 = inlined_call_operand.vmem [shape: f32[16,1], index: 6, kind: input, shape index: {}]   ;;  %s517_s3 = inlined_call_operand.vmem [shape: bf16[32,32], index: 3, kind: input, shape index: {}]   ;;  %s518_s5 = inlined_call_operand.vmem [shape: bf16[16,32], index: 5, kind: input, shape index: {}]   ;;  %s519_s7 = inlined_call_operand.vmem [shape: f32[16,8], index: 7, kind: output, shape index: {}]  }
   0x1   :  { %v27_v0 = vld [vmem:[%s512_s0] sm:$0xff]  ;;  %383 = vset.pattern.permute.xlu0 %v406_v1  ;;  %384 = vset.pattern.permute.xlu1 %v406_v1  ;;  %v34_v5 = vld [vmem:[%s514_s2 + $0x10] sm:$0xff]  ;;  %v33_v7 = vld [vmem:[%s514_s2 + $0x8] sm:$0xff]  ;;  %vm408_vm2 = vmmov 0  }
   0x2   :  { %v48_v2 = vpack.c.bf16 %v27_v0, %v27_v0  ;;  %v385_v3 = vld [vmem:[%s513_s1] sm:$0xff]   ;;  %61 = vperm.xlu1 %384, %v34_v5   ;;  %v35_v8 = vld [vmem:[%s514_s2 + $0x18] sm:$0xff]  ;;  %v386_v9 = vld [vmem:[%s513_s1 + $0x8] sm:$0xff]  }
   0x3   :  { %v32_v4 = vld [vmem:[%s514_s2] sm:$0xff]  ;;  %357 = vmatprep.mubr.msk.bf16.mxu0 %vm79_vm0, %v385_v3  ;;  %v41_v11 = vld [vmem:[%s515_s4 + $0x8] sm:$0xff]  ;;  %v42_v12 = vld [vmem:[%s515_s4 + $0x10] sm:$0xff] }
   0x4   :  { %377 = vmatprep.subr.msk.bf16.mxu0 %vm79_vm0, %v48_v2  ;;  %v87_v6 = vsel %vm79_vm0, %v48_v2, 0  ;;  %51 = vperm.xlu0 %383, %v32_v4   ;;  %v40_v10 = vld [vmem:[%s515_s4] sm:$0xff]  ;;  %v43_v13 = vld [vmem:[%s515_s4 + $0x18] sm:$0xff]  ;;  %v47_v15 = vld [vmem:[%s516_s6 + $0x8] sm:$0xff] }
   0x5   :  { %356 = vmatpush3.bf16.xpose.msra.mxu0 %v87_v6  ;;  %v46_v14 = vld [vmem:[%s516_s6] sm:$0xff]  ;;  %v388_v51 = vld [vmem:[%s517_s3 + $0x8] sm:$0xff]  }
   0x6   :  { %66 = vperm.xlu1 %384, %v35_v8   ;;  %v387_v16 = vld [vmem:[%s517_s3] sm:$0xff]   ;;  %369 = vmatprep.subr.bf16.mxu0 %v407_v52 }
   0x7   :  { %365 = vmatprep.mubr.msk.bf16.mxu1 %vm190_vm1, %v387_v16 }
   0x8   :  { %56 = vperm.xlu0 %383, %v33_v7  }
   0xa   :  { %167 = vperm.xlu1 %384, %v41_v11  }
   0xc   :  { %358 = vmatmul.mubr.msk.bf16.vlgmr.msra.gmra.mrb[0].mxu0 %vm79_vm0, %v386_v9  ;;  %162 = vperm.xlu0 %383, %v40_v10  }
   0xd   :  { %373 = vmatprep.mubr.msk.bf16.mxu0 %vm408_vm2, %v407_v52 }
   0xe   :  { %177 = vperm.xlu1 %384, %v43_v13  }
  0x10   :  { %172 = vperm.xlu0 %383, %v42_v12  }
  0x12   :  { %275 = vperm.xlu1 %384, %v47_v15  }
  0x14   :  { %270 = vperm.xlu0 %383, %v46_v14  }
  0x81   :  { %v62_v17 = vpop.permute.xlu1 %61 }
  0x83   :  { %v52_v18 = vpop.permute.xlu0 %51 }
  0x85   :  { %v67_v22 = vpop.permute.xlu1 %66 }
  0x87   :  { %v57_v25 = vpop.permute.xlu0 %56 }
  0x89   :  { %v168_v54 = vpop.permute.xlu1 %167 }
  0x8b   :  { %v163_v53 = vpop.permute.xlu0 %162 }
  0x8d   :  { %v178_v59 = vpop.permute.xlu1 %177 }
  0x8f   :  { %v173_v55 = vpop.permute.xlu0 %172 }
  0xdf   :  { %v359_v19 = vpop.f32.mrb[0].mxu0 }
  0xe0   :  { %v132_v20 = vadd.f32 %v359_v19, %v62_v17  ;;  %v123_v21 = vpop.f32.mrb[1].mxu0 }
  0xe1   :  { %v124_v23 = vadd.f32 %v123_v21, %v52_v18  ;;  %v360_v24 = vpop.f32.mrb[2].mxu0 }
  0xe2   :  { %v140_v26 = vmul.f32 0.5, %v132_v20  ;;  %v135_v27 = vadd.f32 %v360_v24, %v67_v22  ;;  %v126_v28 = vpop.f32.mrb[3].mxu0  ;;  %v271_v24 = vpop.permute.xlu0 %270 }
  0xe3   :  { %v138_v29 = vmul.f32 0.5, %v124_v23  ;;  %v127_v30 = vadd.f32 %v126_v28, %v57_v25  ;;  %v276_v28 = vpop.permute.xlu1 %275 }
  0xe4   :  { %390 = vtanh.f32 %v140_v26  ;;  %v141_v31 = vmul.f32 0.5, %v135_v27 }
  0xe5   :  { %392 = vtanh.f32 %v138_v29  ;;  %v139_v32 = vmul.f32 0.5, %v127_v30 }
  0xe6   :  { %394 = vtanh.f32 %v141_v31 }
  0xe7   :  { %396 = vtanh.f32 %v139_v32 }
  0xee   :  { %v391_v33 = vpop.eup %390 }
  0xef   :  { %v393_v34 = vpop.eup %392  ;;  %v148_v35 = vmul.f32 0.5, %v391_v33 }
  0xf0   :  { %v395_v36 = vpop.eup %394  ;;  %v146_v37 = vmul.f32 0.5, %v393_v34 }
  0xf1   :  { %v397_v38 = vpop.eup %396  ;;  %v152_v39 = vadd.f32 0.5, %v148_v35  ;;  %v149_v40 = vmul.f32 0.5, %v395_v36 }
  0xf2   :  { %v150_v41 = vadd.f32 0.5, %v146_v37  ;;  %v147_v42 = vmul.f32 0.5, %v397_v38 }
  0xf3   :  { %v153_v43 = vadd.f32 0.5, %v149_v40  ;;  %v156_v45 = vmul.f32 %v152_v39, %v132_v20 }
  0xf4   :  { %v151_v44 = vadd.f32 0.5, %v147_v42  ;;  %v154_v47 = vmul.f32 %v150_v41, %v124_v23  ;;  %v389_v23 = vld [vmem:[%s518_s5] sm:$0xff]  }
  0xf5   :  { %v157_v46 = vmul.f32 %v153_v43, %v135_v27 }
  0xf6   :  { %v155_v48 = vmul.f32 %v151_v44, %v127_v30 }
  0xf7   :  { %v159_v49 = vpack.c.bf16 %v157_v46, %v156_v45 }
  0xf8   :  { %v158_v50 = vpack.c.bf16 %v155_v48, %v154_v47 }
  0xfa   :  { %361 = vmatprep.subr.bf16.mxu1 %v158_v50 }
  0xfb   :  { %362 = vmatpush3.bf16.msra.mxu1 %v158_v50 }
  0xfc   :  { %363 = vmatprep.subr.bf16.mxu1 %v159_v49 }
  0xff   :  { %364 = vmatpush3.bf16.msra.mxu1 %v159_v49 }
 0x102   :  { %366 = vmatmul.mubr.msk.bf16.vlgmr.msra.gmra.mrb[0].mxu1 %vm190_vm1, %v388_v51 }
 0x1d5   :  { %v367_v56 = vpop.f32.mrb[0].mxu1 }
 0x1d6   :  { %v240_v57 = vadd.f32 %v367_v56, %v173_v55  ;;  %v231_v58 = vpop.f32.mrb[1].mxu1 }
 0x1d7   :  { %v232_v60 = vadd.f32 %v231_v58, %v163_v53  ;;  %v368_v61 = vpop.f32.mrb[2].mxu1 }
 0x1d8   :  { %v248_v62 = vmul.f32 0.5, %v240_v57  ;;  %v243_v63 = vadd.f32 %v368_v61, %v178_v59  ;;  %v234_v0 = vpop.f32.mrb[3].mxu1 }
 0x1d9   :  { %v246_v1 = vmul.f32 0.5, %v232_v60  ;;  %v235_v2 = vadd.f32 %v234_v0, %v168_v54 }
 0x1da   :  { %398 = vtanh.f32 %v248_v62  ;;  %v249_v3 = vmul.f32 0.5, %v243_v63 }
 0x1db   :  { %400 = vtanh.f32 %v246_v1  ;;  %v247_v4 = vmul.f32 0.5, %v235_v2 }
 0x1dc   :  { %402 = vtanh.f32 %v249_v3 }
 0x1dd   :  { %404 = vtanh.f32 %v247_v4 }
 0x1e4   :  { %v399_v5 = vpop.eup %398 }
 0x1e5   :  { %v401_v6 = vpop.eup %400  ;;  %v256_v7 = vmul.f32 0.5, %v399_v5 }
 0x1e6   :  { %v403_v8 = vpop.eup %402  ;;  %v254_v9 = vmul.f32 0.5, %v401_v6 }
 0x1e7   :  { %v405_v10 = vpop.eup %404  ;;  %v260_v11 = vadd.f32 0.5, %v256_v7  ;;  %v257_v12 = vmul.f32 0.5, %v403_v8 }
 0x1e8   :  { %v258_v13 = vadd.f32 0.5, %v254_v9  ;;  %v255_v14 = vmul.f32 0.5, %v405_v10 }
 0x1e9   :  { %v261_v15 = vadd.f32 0.5, %v257_v12  ;;  %v264_v17 = vmul.f32 %v260_v11, %v240_v57 }
 0x1ea   :  { %v259_v16 = vadd.f32 0.5, %v255_v14  ;;  %v262_v19 = vmul.f32 %v258_v13, %v232_v60 }
 0x1eb   :  { %v265_v18 = vmul.f32 %v261_v15, %v243_v63 }
 0x1ec   :  { %v263_v20 = vmul.f32 %v259_v16, %v235_v2 }
 0x1ed   :  { %v267_v21 = vpack.c.bf16 %v265_v18, %v264_v17 }
 0x1ee   :  { %v266_v22 = vpack.c.bf16 %v263_v20, %v262_v19 }
 0x1f0   :  { %370 = vmatpush3.bf16.msra.mxu0 %v266_v22 }
 0x1f1   :  { %371 = vmatprep.subr.bf16.mxu0 %v407_v52 }
 0x1f4   :  { %372 = vmatpush3.bf16.msra.mxu0 %v267_v21 }
 0x1f7   :  { %374 = vmatmul.mubr.msk.bf16.vlgmr.msra.gmra.mrb[4].mxu0 %vm190_vm1, %v389_v23 }
 0x2ca   :  { %v320_v25 = vpop.f32.mrb[4].mxu0 }
 0x2cb   :  { %v321_v26 = vadd.f32 %v320_v25, %v271_v24  ;;  %v375_v27 = vpop.f32.mrb[5].mxu0 }
 0x2cc   :  { %v323_v29 = vpop.f32.mrb[6].mxu0 }
 0x2cd   :  { %v378_v30 = vround.rtne.f32 %v321_v26  ;;  %v324_v31 = vadd.f32 %v323_v29, %v276_v28  ;;  %v376_v32 = vpop.f32.mrb[7].mxu0 }
 0x2cf   :  { %329 = vst.msk [vmem:[%s519_s7] sm:$0xff] %vm79_vm0, %v378_v30  ;;  %v379_v33 = vround.rtne.f32 %v324_v31 }
 0x2d1   :  { %330 = vst.msk [vmem:[%s519_s7 + $0x8] sm:$0xff] %vm79_vm0, %v379_v33 }

</bundles_post_ra>
